<compile_context>
chip_gen: v7x
topology: tpu7x:2x2x1
jax: 0.10.0
libtpu: 0.0.40
codegen_flags: <defaults>
</compile_context>

<pallas_src>
import math
import functools

import numpy as np
import jax
import jax.numpy as jnp
from jax.experimental import pallas as pl
from jax.experimental.pallas import tpu as pltpu

# ---------------------------------------------------------------------------
# Problem sizes
# ---------------------------------------------------------------------------
BATCH = 2
N_NODES = 16            # nodes per graph (original: 17186)
F_IN = 6
F_HID = 64
F_OUT = 32
META = 4                # unused metadata columns (original: data[:, 103116:])
RATIO = 0.7
K_KEEP = int(math.ceil(RATIO * N_NODES))   # 12
FP = 128                # padded feature/lane width

_VMEM = pl.BlockSpec(memory_space=pltpu.MemorySpace.VMEM)

# ---------------------------------------------------------------------------
# Pallas kernels
# ---------------------------------------------------------------------------
def _conv1_score_kernel(a_ref, x_ref, w1_ref, b1_ref, wp_ref, bp_ref, h1_ref, s_ref):
    """Fused conv1 + SAGPooling score:
         h1    = relu(A_hat @ (X @ W1) + b1)
         score = (A_hat @ (h1 @ Wp) + bp)[:, :1]
       A_hat, X and h1 are reused directly from VMEM for the second matmul chain."""
    xw = jnp.dot(x_ref[...], w1_ref[...], preferred_element_type=jnp.float32)
    h1 = jnp.dot(a_ref[...], xw, preferred_element_type=jnp.float32) + b1_ref[...]
    h1 = jnp.maximum(h1, 0.0)
    h1_ref[...] = h1
    sw = jnp.dot(h1, wp_ref[...], preferred_element_type=jnp.float32)
    s = jnp.dot(a_ref[...], sw, preferred_element_type=jnp.float32) + bp_ref[...]
    s_ref[...] = s[:, :1]                                 # only the valid score column


def _conv2_head_kernel(a_ref, x_ref, s_ref, w2_ref, b2_ref, wfc_ref, bfc_ref, o_ref,
                       *, batch, k):
    """Fused SAG gating + conv2 + global_max_pool + Linear + Sigmoid:
         h2     = relu(A_hat2 @ ((x * tanh(score)) @ W2) + b2)   (never leaves VMEM)
         pooled = per-graph max over the k kept rows of each graph
         out    = sigmoid(pooled @ Wfc + bfc)   — one MXU push, one lane-dense store."""
    gated = x_ref[...] * jnp.tanh(s_ref[...])             # (Nk,1) -> (Nk,FP) broadcast, VPU
    xw = jnp.dot(gated, w2_ref[...], preferred_element_type=jnp.float32)
    h2 = jnp.dot(a_ref[...], xw, preferred_element_type=jnp.float32) + b2_ref[...]
    h2 = jnp.maximum(h2, 0.0)

    # Per-graph segment max via masking (avoids non-8-aligned sublane reshapes/slices).
    row_id = jax.lax.broadcasted_iota(jnp.int32, h2.shape, 0)
    pooled = jnp.concatenate(
        [jnp.max(jnp.where((row_id >= b * k) & (row_id < (b + 1) * k), h2, -jnp.inf),
                 axis=0, keepdims=True)
         for b in range(batch)],
        axis=0)                                           # (batch, FP)

    logit = jnp.dot(pooled, wfc_ref[...], preferred_element_type=jnp.float32) + bfc_ref[...]
    o_ref[...] = jax.nn.sigmoid(logit)                    # single full-block store


# ---------------------------------------------------------------------------
# Glue: graph setup, padding, parameter init
# ---------------------------------------------------------------------------
def build_adj(edge_index, n):
    """Dense adjacency (no self loops): A[dst, src] = 1  (source-to-target flow)."""
    a = jnp.zeros((n, n), jnp.float32)
    return a.at[edge_index[1], edge_index[0]].set(1.0)


def gcn_norm_dense(adj):
    """A_hat = D^-1/2 (A + I) D^-1/2 — GCNConv's default normalization."""
    n = adj.shape[0]
    a = adj + jnp.eye(n, dtype=adj.dtype)
    deg = a.sum(axis=1)
    dinv = jax.lax.rsqrt(deg)
    return a * dinv[:, None] * dinv[None, :]


def pad_to(a, shape):
    out = jnp.zeros(shape, a.dtype)
    return out.at[tuple(slice(0, s) for s in a.shape)].set(a)


def init_params():
    ks = jax.random.split(jax.random.PRNGKey(42), 8)
    return {
        "w1": jax.random.normal(ks[0], (F_IN, F_HID), jnp.float32) * 0.1,
        "b1": jax.random.normal(ks[1], (F_HID,), jnp.float32) * 0.1,
        "wp": jax.random.normal(ks[2], (F_HID, 1), jnp.float32) * 0.1,   # SAGPooling GNN
        "bp": jax.random.normal(ks[3], (1,), jnp.float32) * 0.1,
        "w2": jax.random.normal(ks[4], (F_HID, F_OUT), jnp.float32) * 0.1,
        "b2": jax.random.normal(ks[5], (F_OUT,), jnp.float32) * 0.1,
        "wfc": jax.random.normal(ks[6], (F_OUT, 1), jnp.float32) * 0.1,  # Linear(32,1)
        "bfc": jax.random.normal(ks[7], (1,), jnp.float32) * 0.1,
    }


def prepare_params(params):
    """One-time TPU-layout padding of all weights (hoisted out of the per-call forward)."""
    return {
        "w1": pad_to(params["w1"], (FP, FP)),
        "b1": pad_to(params["b1"][None, :], (1, FP)),
        "wp": pad_to(params["wp"], (FP, FP)),
        "bp": pad_to(params["bp"][None, :], (1, FP)),
        "w2": pad_to(params["w2"], (FP, FP)),
        "b2": pad_to(params["b2"][None, :], (1, FP)),
        "wfc": pad_to(params["wfc"], (FP, FP)),
        "bfc": pad_to(params["bfc"][None, :], (1, FP)),
    }


# ---------------------------------------------------------------------------
# Forward pass (Pallas path, jit-fused end to end)
# ---------------------------------------------------------------------------
@jax.jit
def mynet_forward(data, edge_index, pp):
    batch_size = data.shape[0]
    x = data[:, : N_NODES * F_IN].reshape(-1, F_IN)       # (N, 6); metadata tail ignored
    n_total = batch_size * N_NODES

    # Dense normalized adjacency for the whole batched graph. As in the original code,
    # edge_index only covers the first graph's nodes; other nodes get self-loops only.
    adj = build_adj(edge_index, n_total)
    ahat1 = gcn_norm_dense(adj)
    x_p = pad_to(x, (n_total, FP))

    # ---- fused kernel 1: relu(GCNConv(6->64)) + SAGPooling score -------------
    h1_p, score_col = pl.pallas_call(
        _conv1_score_kernel,
        out_shape=(jax.ShapeDtypeStruct((n_total, FP), jnp.float32),
                   jax.ShapeDtypeStruct((n_total, 1), jnp.float32)),
        in_specs=[_VMEM] * 6,
        out_specs=(_VMEM, _VMEM),
    )(ahat1, x_p, pp["w1"], pp["b1"], pp["wp"], pp["bp"])
    score = score_col[:, 0]                               # (N,)

    # ---- SAGPooling top-k selection + induced subgraph (plain jit-fused JAX) ----
    # TODO(synk): per-graph top-k + data-dependent gather has no clean static-BlockSpec
    # Pallas path at this size; done between the two kernels in JAX.
    idx = jax.lax.top_k(score.reshape(batch_size, N_NODES), K_KEEP)[1]
    perm = (idx + jnp.arange(batch_size)[:, None] * N_NODES).reshape(-1)   # (batch*k,)

    xp = h1_p[perm]                                       # (Nk, FP), gathered features
    sp = score[perm][:, None]                             # (Nk, 1) — broadcast in-kernel
    ahat2 = gcn_norm_dense(adj[perm][:, perm])            # induced subgraph (filter_adj)

    # ---- fused kernel 2: gating + relu(GCNConv(64->32)) + gmp + Linear + Sigmoid ----
    out_p = pl.pallas_call(
        functools.partial(_conv2_head_kernel, batch=batch_size, k=K_KEEP),
        out_shape=jax.ShapeDtypeStruct((batch_size, FP), jnp.float32),
        in_specs=[_VMEM] * 7,
        out_specs=_VMEM,
    )(ahat2, xp, sp, pp["w2"], pp["b2"], pp["wfc"], pp["bfc"])
    return out_p[:, :1]                                   # (batch, 1)


# ---------------------------------------------------------------------------
# Pure-JAX reference (mirror of the PyTorch forward) for a sanity check
# ---------------------------------------------------------------------------
def ref_forward(data, edge_index, params):
    batch_size = data.shape[0]
    x = data[:, : N_NODES * F_IN].reshape(-1, F_IN)
    n_total = batch_size * N_NODES
    adj = build_adj(edge_index, n_total)
    ahat = gcn_norm_dense(adj)
    h1 = jax.nn.relu(ahat @ (x @ params["w1"]) + params["b1"])
    score = (ahat @ (h1 @ params["wp"]) + params["bp"])[:, 0]
    idx = jax.lax.top_k(score.reshape(batch_size, N_NODES), K_KEEP)[1]
    perm = (idx + jnp.arange(batch_size)[:, None] * N_NODES).reshape(-1)
    xp = h1[perm] * jnp.tanh(score[perm])[:, None]
    ahat2 = gcn_norm_dense(adj[perm][:, perm])
    h2 = jax.nn.relu(ahat2 @ (xp @ params["w2"]) + params["b2"])
    pooled = h2.reshape(batch_size, K_KEEP, F_OUT).max(axis=1)
    return jax.nn.sigmoid(pooled @ params["wfc"] + params["bfc"])


# ---------------------------------------------------------------------------
if __name__ == "__main__":
    # Deterministic inputs
    key = jax.random.PRNGKey(0)
    data = jax.random.normal(key, (BATCH, N_NODES * F_IN + META), jnp.float32)

    # edge_index: symmetric ring over the first graph's nodes (as in the original,
    # edge_index is defined only over one graph's node ids).
    src = jnp.arange(N_NODES, dtype=jnp.int32)
    dst = (src + 1) % N_NODES
    edge_index = jnp.stack([jnp.concatenate([src, dst]),
                            jnp.concatenate([dst, src])], axis=0)   # (2, 32)

    params = init_params()
    padded_params = prepare_params(params)                 # one-time layout prep

    out = mynet_forward(data, edge_index, padded_params)
    out = jax.block_until_ready(out)

    ref = jax.block_until_ready(ref_forward(data, edge_index, params))
    assert out.shape == (BATCH, 1), out.shape
    np.testing.assert_allclose(np.asarray(out), np.asarray(ref), atol=1e-2, rtol=1e-2)

    print("KERNEL_OK")
</pallas_src>

<mosaic_0001>
module attributes {stable_mosaic.version = 11 : i64} {
  func.func @_conv1_score_kernel(%arg0: memref<32x32xf32, #tpu.memory_space<vmem>>, %arg1: memref<32x128xf32, #tpu.memory_space<vmem>>, %arg2: memref<128x128xf32, #tpu.memory_space<vmem>>, %arg3: memref<1x128xf32, #tpu.memory_space<vmem>>, %arg4: memref<128x128xf32, #tpu.memory_space<vmem>>, %arg5: memref<1x128xf32, #tpu.memory_space<vmem>>, %arg6: memref<32x128xf32, #tpu.memory_space<vmem>>, %arg7: memref<32x1xf32, #tpu.memory_space<vmem>>) attributes {dimension_semantics = [], scalar_prefetch = 0 : i64, scratch_operands = 0 : i64, tpu.core_type = #tpu.core_type<tc>} {
    %c0 = arith.constant 0 : index
    %c0_0 = arith.constant 0 : index
    %0 = vector.load %arg1[%c0, %c0_0] : memref<32x128xf32, #tpu.memory_space<vmem>>, vector<32x128xf32>
    %c0_1 = arith.constant 0 : index
    %c0_2 = arith.constant 0 : index
    %1 = vector.load %arg2[%c0_1, %c0_2] : memref<128x128xf32, #tpu.memory_space<vmem>>, vector<128x128xf32>
    %cst = arith.constant dense<0.000000e+00> : vector<32x128xf32>
    %2 = tpu.matmul %0, %1, %cst {dimension_numbers = #tpu.dot_dimension_numbers<[1], [0], [0], [1], [0, 0, 1, 1], [], []>} : vector<32x128xf32>, vector<128x128xf32>, vector<32x128xf32> -> vector<32x128xf32>
    %c0_3 = arith.constant 0 : index
    %c0_4 = arith.constant 0 : index
    %3 = vector.load %arg0[%c0_3, %c0_4] : memref<32x32xf32, #tpu.memory_space<vmem>>, vector<32x32xf32>
    %cst_5 = arith.constant dense<0.000000e+00> : vector<32x128xf32>
    %4 = tpu.matmul %3, %2, %cst_5 {dimension_numbers = #tpu.dot_dimension_numbers<[1], [0], [0], [1], [0, 0, 1, 1], [], []>} : vector<32x32xf32>, vector<32x128xf32>, vector<32x128xf32> -> vector<32x128xf32>
    %c0_6 = arith.constant 0 : index
    %c0_7 = arith.constant 0 : index
    %5 = vector.load %arg3[%c0_6, %c0_7] : memref<1x128xf32, #tpu.memory_space<vmem>>, vector<1x128xf32>
    %6 = vector.broadcast %5 : vector<1x128xf32> to vector<32x128xf32>
    %7 = arith.addf %4, %6 : vector<32x128xf32>
    %cst_8 = arith.constant 0.000000e+00 : f32
    %8 = vector.broadcast %cst_8 : f32 to vector<32x128xf32>
    %9 = arith.maximumf %7, %8 : vector<32x128xf32>
    %c0_9 = arith.constant 0 : index
    %c0_10 = arith.constant 0 : index
    %10 = vector.load %arg6[%c0_9, %c0_10] : memref<32x128xf32, #tpu.memory_space<vmem>>, vector<32x128xf32>
    tpu.vector_store %arg6[%c0_9, %c0_10], %9 {strides = array<i32>} : memref<32x128xf32, #tpu.memory_space<vmem>>, vector<32x128xf32>,
    %c0_11 = arith.constant 0 : index
    %c0_12 = arith.constant 0 : index
    %11 = vector.load %arg4[%c0_11, %c0_12] : memref<128x128xf32, #tpu.memory_space<vmem>>, vector<128x128xf32>
    %cst_13 = arith.constant dense<0.000000e+00> : vector<32x128xf32>
    %12 = tpu.matmul %9, %11, %cst_13 {dimension_numbers = #tpu.dot_dimension_numbers<[1], [0], [0], [1], [0, 0, 1, 1], [], []>} : vector<32x128xf32>, vector<128x128xf32>, vector<32x128xf32> -> vector<32x128xf32>
    %c0_14 = arith.constant 0 : index
    %c0_15 = arith.constant 0 : index
    %13 = vector.load %arg0[%c0_14, %c0_15] : memref<32x32xf32, #tpu.memory_space<vmem>>, vector<32x32xf32>
    %cst_16 = arith.constant dense<0.000000e+00> : vector<32x128xf32>
    %14 = tpu.matmul %13, %12, %cst_16 {dimension_numbers = #tpu.dot_dimension_numbers<[1], [0], [0], [1], [0, 0, 1, 1], [], []>} : vector<32x32xf32>, vector<32x128xf32>, vector<32x128xf32> -> vector<32x128xf32>
    %c0_17 = arith.constant 0 : index
    %c0_18 = arith.constant 0 : index
    %15 = vector.load %arg5[%c0_17, %c0_18] : memref<1x128xf32, #tpu.memory_space<vmem>>, vector<1x128xf32>
    %16 = vector.broadcast %15 : vector<1x128xf32> to vector<32x128xf32>
    %17 = arith.addf %14, %16 : vector<32x128xf32>
    %18 = vector.extract_strided_slice %17 {offsets = [0, 0], sizes = [32, 1], strides = [1, 1]} : vector<32x128xf32> to vector<32x1xf32>
    %c0_19 = arith.constant 0 : index
    %c0_20 = arith.constant 0 : index
    %19 = vector.load %arg7[%c0_19, %c0_20] : memref<32x1xf32, #tpu.memory_space<vmem>>, vector<32x1xf32>
    tpu.vector_store %arg7[%c0_19, %c0_20], %18 {strides = array<i32>} : memref<32x1xf32, #tpu.memory_space<vmem>>, vector<32x1xf32>,
    return
  }
}

module attributes {stable_mosaic.version = 11 : i64} {
  func.func @_conv2_head_kernel(%arg0: memref<24x24xf32, #tpu.memory_space<vmem>>, %arg1: memref<24x128xf32, #tpu.memory_space<vmem>>, %arg2: memref<24x1xf32, #tpu.memory_space<vmem>>, %arg3: memref<128x128xf32, #tpu.memory_space<vmem>>, %arg4: memref<1x128xf32, #tpu.memory_space<vmem>>, %arg5: memref<128x128xf32, #tpu.memory_space<vmem>>, %arg6: memref<1x128xf32, #tpu.memory_space<vmem>>, %arg7: memref<2x128xf32, #tpu.memory_space<vmem>>) attributes {dimension_semantics = [], scalar_prefetch = 0 : i64, scratch_operands = 0 : i64, tpu.core_type = #tpu.core_type<tc>} {
    %c0 = arith.constant 0 : index
    %c0_0 = arith.constant 0 : index
    %0 = vector.load %arg1[%c0, %c0_0] : memref<24x128xf32, #tpu.memory_space<vmem>>, vector<24x128xf32>
    %c0_1 = arith.constant 0 : index
    %c0_2 = arith.constant 0 : index
    %1 = vector.load %arg2[%c0_1, %c0_2] : memref<24x1xf32, #tpu.memory_space<vmem>>, vector<24x1xf32>
    %2 = math.tanh %1 : vector<24x1xf32>
    %3 = vector.broadcast %2 : vector<24x1xf32> to vector<24x128xf32>
    %4 = arith.mulf %0, %3 : vector<24x128xf32>
    %c0_3 = arith.constant 0 : index
    %c0_4 = arith.constant 0 : index
    %5 = vector.load %arg3[%c0_3, %c0_4] : memref<128x128xf32, #tpu.memory_space<vmem>>, vector<128x128xf32>
    %cst = arith.constant dense<0.000000e+00> : vector<24x128xf32>
    %6 = tpu.matmul %4, %5, %cst {dimension_numbers = #tpu.dot_dimension_numbers<[1], [0], [0], [1], [0, 0, 1, 1], [], []>} : vector<24x128xf32>, vector<128x128xf32>, vector<24x128xf32> -> vector<24x128xf32>
    %c0_5 = arith.constant 0 : index
    %c0_6 = arith.constant 0 : index
    %7 = vector.load %arg0[%c0_5, %c0_6] : memref<24x24xf32, #tpu.memory_space<vmem>>, vector<24x24xf32>
    %cst_7 = arith.constant dense<0.000000e+00> : vector<24x128xf32>
    %8 = tpu.matmul %7, %6, %cst_7 {dimension_numbers = #tpu.dot_dimension_numbers<[1], [0], [0], [1], [0, 0, 1, 1], [], []>} : vector<24x24xf32>, vector<24x128xf32>, vector<24x128xf32> -> vector<24x128xf32>
    %c0_8 = arith.constant 0 : index
    %c0_9 = arith.constant 0 : index
    %9 = vector.load %arg4[%c0_8, %c0_9] : memref<1x128xf32, #tpu.memory_space<vmem>>, vector<1x128xf32>
    %10 = vector.broadcast %9 : vector<1x128xf32> to vector<24x128xf32>
    %11 = arith.addf %8, %10 : vector<24x128xf32>
    %cst_10 = arith.constant 0.000000e+00 : f32
    %12 = vector.broadcast %cst_10 : f32 to vector<24x128xf32>
    %13 = arith.maximumf %11, %12 : vector<24x128xf32>
    %14 = tpu.iota {dimensions = array<i32: 0>} : vector<24x128xi32>
    %c0_i32 = arith.constant 0 : i32
    %15 = vector.broadcast %c0_i32 : i32 to vector<24x128xi32>
    %16 = arith.cmpi sge, %14, %15 : vector<24x128xi32>
    %c12_i32 = arith.constant 12 : i32
    %17 = vector.broadcast %c12_i32 : i32 to vector<24x128xi32>
    %18 = arith.cmpi slt, %14, %17 : vector<24x128xi32>
    %19 = arith.andi %16, %18 : vector<24x128xi1>
    %cst_11 = arith.constant 0xFF800000 : f32
    %20 = vector.broadcast %cst_11 : f32 to vector<24x128xf32>
    %21 = arith.select %19, %13, %20 : vector<24x128xi1>, vector<24x128xf32>
    %cst_12 = arith.constant dense<0xFF800000> : vector<128xf32>
    %22 = vector.multi_reduction <maximumf>, %21, %cst_12 [0] : vector<24x128xf32> to vector<128xf32>
    %23 = vector.shape_cast %22 : vector<128xf32> to vector<1x128xf32>
    %c12_i32_13 = arith.constant 12 : i32
    %24 = vector.broadcast %c12_i32_13 : i32 to vector<24x128xi32>
    %25 = arith.cmpi sge, %14, %24 : vector<24x128xi32>
    %c24_i32 = arith.constant 24 : i32
    %26 = vector.broadcast %c24_i32 : i32 to vector<24x128xi32>
    %27 = arith.cmpi slt, %14, %26 : vector<24x128xi32>
    %28 = arith.andi %25, %27 : vector<24x128xi1>
    %cst_14 = arith.constant 0xFF800000 : f32
    %29 = vector.broadcast %cst_14 : f32 to vector<24x128xf32>
    %30 = arith.select %28, %13, %29 : vector<24x128xi1>, vector<24x128xf32>
    %cst_15 = arith.constant dense<0xFF800000> : vector<128xf32>
    %31 = vector.multi_reduction <maximumf>, %30, %cst_15 [0] : vector<24x128xf32> to vector<128xf32>
    %32 = vector.shape_cast %31 : vector<128xf32> to vector<1x128xf32>
    %33 = tpu.concatenate %23, %32 in 0 : vector<1x128xf32>, vector<1x128xf32> -> vector<2x128xf32>
    %c0_16 = arith.constant 0 : index
    %c0_17 = arith.constant 0 : index
    %34 = vector.load %arg5[%c0_16, %c0_17] : memref<128x128xf32, #tpu.memory_space<vmem>>, vector<128x128xf32>
    %cst_18 = arith.constant dense<0.000000e+00> : vector<2x128xf32>
    %35 = tpu.matmul %33, %34, %cst_18 {dimension_numbers = #tpu.dot_dimension_numbers<[1], [0], [0], [1], [0, 0, 1, 1], [], []>} : vector<2x128xf32>, vector<128x128xf32>, vector<2x128xf32> -> vector<2x128xf32>
    %c0_19 = arith.constant 0 : index
    %c0_20 = arith.constant 0 : index
    %36 = vector.load %arg6[%c0_19, %c0_20] : memref<1x128xf32, #tpu.memory_space<vmem>>, vector<1x128xf32>
    %37 = vector.broadcast %36 : vector<1x128xf32> to vector<2x128xf32>
    %38 = arith.addf %35, %37 : vector<2x128xf32>
    %39 = arith.negf %38 : vector<2x128xf32>
    %40 = math.exp %39 : vector<2x128xf32>
    %cst_21 = arith.constant 1.000000e+00 : f32
    %41 = vector.broadcast %cst_21 : f32 to vector<2x128xf32>
    %42 = arith.addf %41, %40 : vector<2x128xf32>
    %43 = arith.divf %41, %42 : vector<2x128xf32>
    %c0_22 = arith.constant 0 : index
    %c0_23 = arith.constant 0 : index
    %44 = vector.load %arg7[%c0_22, %c0_23] : memref<2x128xf32, #tpu.memory_space<vmem>>, vector<2x128xf32>
    tpu.vector_store %arg7[%c0_22, %c0_23], %43 {strides = array<i32>} : memref<2x128xf32, #tpu.memory_space<vmem>>, vector<2x128xf32>,
    return
  }
}

</mosaic_0001>

<bundles_post_ra>
// kernel: squeeze.7
= control target key start
LH: loop header
LB: loop body
LE: loop exit
PB: predicated region body
PF: predicated region fallthrough
CT: control target
= control target key end

     0   :  { %vm7_vm0 = vcmask 130048   ;;  %s39_s0 = inlined_call_operand.vmem [shape: f32[32], index: 0, kind: input, shape index: {}]   ;;  %s40_s1 = inlined_call_operand.vmem [shape: f32[2,16], index: 1, kind: output, shape index: {}]  }
   0x1   :  { %v4_v0 = vld [vmem:[%s39_s0] sm:$0x1]  ;;  %s22_s0 = smov 112  }
   0x2   :  { %5 = vst [vmem:[#allocation1] sm:$0x1] %v4_v0 }
   0x9   :  { %v9_v1 = vld [vmem:[#allocation1] sm:$0x1]  }
   0xa   :  { %v6_v2 = vld [vmem:[#allocation1] sm:$0x1]   ;;  %10 = vrot.lane.b32.xlu0 %v9_v1, %s22_s0 }
   0xb   :  { %8 = vst.msk [vmem:[#allocation0] sm:$0x1] %vm7_vm0, %v6_v2  }
  0x7c   :  { %v11_v3 = vpop.permute.xlu0 %10  }
  0x7d   :  { %14 = vst.msk [vmem:[#allocation0 + $0x1] sm:$0x1] %vm7_vm0, %v11_v3  }
  0x84   :  { %v18_v4 = vld [vmem:[#allocation0] sm:$0x3] }
  0x85   :  { %20 = vst [vmem:[%s40_s1] sm:$0x3] %v18_v4 }

// kernel: mynet_forward.2
= control target key start
LH: loop header
LB: loop body
LE: loop exit
PB: predicated region body
PF: predicated region fallthrough
CT: control target
= control target key end

     0   :  { %vm141_vm0 = vcmask 261120   ;;  %vm456_vm1 = vcmask 7168   ;;  %s929_s2 = inlined_call_operand.vmem [shape: f32[128,128], index: 2, kind: input, shape index: {}]   ;;  %s930_s1 = inlined_call_operand.vmem [shape: f32[32,128], index: 1, kind: input, shape index: {}]   ;;  %s931_s0 = inlined_call_operand.vmem [shape: f32[32,32], index: 0, kind: input, shape index: {}]   ;;  %s932_s4 = inlined_call_operand.vmem [shape: f32[128,128], index: 4, kind: input, shape index: {}]   ;;  %s933_s3 = inlined_call_operand.vmem [shape: f32[1,128], index: 3, kind: input, shape index: {}]   ;;  %s934_s6 = inlined_call_operand.vmem [shape: f32[32,128], index: 6, kind: output, shape index: {0}]   ;;  %s935_s5 = inlined_call_operand.vmem [shape: f32[1,128], index: 5, kind: input, shape index: {}]   ;;  %s936_s7 = inlined_call_operand.vmem [shape: f32[32,1], index: 7, kind: output, shape index: {1}]  }
   0x1   :  { %v29_v0 = vld [vmem:[%s929_s2] sm:$0xff]  ;;  %v30_v1 = vld [vmem:[%s929_s2 + $0x8] sm:$0xff]  ;;  %v31_v2 = vld [vmem:[%s929_s2 + $0x10] sm:$0xff] }
   0x2   :  { %v639_v3 = vpack.c.bf16 %v30_v1, %v29_v0  ;;  %v32_v4 = vld [vmem:[%s929_s2 + $0x18] sm:$0xff]  ;;  %v33_v6 = vld [vmem:[%s929_s2 + $0x20] sm:$0xff]  ;;  %v34_v7 = vld [vmem:[%s929_s2 + $0x28] sm:$0xff] }
   0x3   :  { %v643_v5 = vpack.c.bf16 %v32_v4, %v31_v2  ;;  %v647_v8 = vpack.c.bf16 %v34_v7, %v33_v6  ;;  %v25_v9 = vld [vmem:[%s930_s1] sm:$0xff]  ;;  %v35_v10 = vld [vmem:[%s929_s2 + $0x30] sm:$0xff]  ;;  %v36_v11 = vld [vmem:[%s929_s2 + $0x38] sm:$0xff] }
   0x4   :  { %640 = vmatprep.subr.bf16.mxu0 %v639_v3  ;;  %567 = vmatprep.mubr.f32.mxu0 %v25_v9  ;;  %v651_v12 = vpack.c.bf16 %v36_v11, %v35_v10  ;;  %v37_v13 = vld [vmem:[%s929_s2 + $0x40] sm:$0xff]  ;;  %v38_v14 = vld [vmem:[%s929_s2 + $0x48] sm:$0xff]  ;;  %v39_v16 = vld [vmem:[%s929_s2 + $0x50] sm:$0xff] }
   0x5   :  { %642 = vmatpush3.bf16.msra.mxu0 %v639_v3  ;;  %v655_v15 = vpack.c.bf16 %v38_v14, %v37_v13  ;;  %v40_v17 = vld [vmem:[%s929_s2 + $0x58] sm:$0xff]  ;;  %v41_v19 = vld [vmem:[%s929_s2 + $0x60] sm:$0xff]  ;;  %v42_v20 = vld [vmem:[%s929_s2 + $0x68] sm:$0xff] }
   0x6   :  { %644 = vmatprep.subr.bf16.mxu0 %v643_v5  ;;  %v659_v18 = vpack.c.bf16 %v40_v17, %v39_v16  ;;  %v663_v21 = vpack.c.bf16 %v42_v20, %v41_v19  ;;  %v43_v22 = vld [vmem:[%s929_s2 + $0x70] sm:$0xff]  ;;  %v44_v23 = vld [vmem:[%s929_s2 + $0x78] sm:$0xff]  ;;  %v26_v25 = vld [vmem:[%s930_s1 + $0x8] sm:$0xff] }
   0x7   :  { %v667_v24 = vpack.c.bf16 %v44_v23, %v43_v22  ;;  %v27_v26 = vld [vmem:[%s930_s1 + $0x10] sm:$0xff]  ;;  %v28_v27 = vld [vmem:[%s930_s1 + $0x18] sm:$0xff]  ;;  %v130_v28 = vld [vmem:[%s931_s0] sm:$0xff] }
   0x8   :  { %581 = vmatprep.mubr.msk.f32.mxu1 %vm141_vm0, %v130_v28  ;;  %v247_v32 = vld [vmem:[%s932_s4] sm:$0xff]  ;;  %v248_v33 = vld [vmem:[%s932_s4 + $0x8] sm:$0xff]  ;;  %v249_v38 = vld [vmem:[%s932_s4 + $0x10] sm:$0xff] }
   0x9   :  { %646 = vmatpush3.bf16.msra.mxu0 %v643_v5  ;;  %v679_v37 = vpack.c.bf16 %v248_v33, %v247_v32  ;;  %v250_v39 = vld [vmem:[%s932_s4 + $0x18] sm:$0xff]  ;;  %v839_v40 = vld [vmem:[%s931_s0 + $0x8] sm:$0xff]  ;;  %v844_v41 = vld [vmem:[%s931_s0 + $0x10] sm:$0xff] }
   0xa   :  { %648 = vmatprep.subr.bf16.mxu0 %v647_v8  ;;  %v683_v42 = vpack.c.bf16 %v250_v39, %v249_v38  ;;  %v251_v43 = vld [vmem:[%s932_s4 + $0x20] sm:$0xff]  ;;  %v252_v44 = vld [vmem:[%s932_s4 + $0x28] sm:$0xff]  ;;  %v859_v45 = vld [vmem:[%s931_s0 + $0x18] sm:$0xff] }
   0xb   :  { %v687_v46 = vpack.c.bf16 %v252_v44, %v251_v43  ;;  %v253_v47 = vld [vmem:[%s932_s4 + $0x30] sm:$0xff]  ;;  %v254_v48 = vld [vmem:[%s932_s4 + $0x38] sm:$0xff]  ;;  %v255_v50 = vld [vmem:[%s932_s4 + $0x40] sm:$0xff] }
   0xc   :  { %v691_v49 = vpack.c.bf16 %v254_v48, %v253_v47  ;;  %v256_v51 = vld [vmem:[%s932_s4 + $0x48] sm:$0xff]  ;;  %v257_v53 = vld [vmem:[%s932_s4 + $0x50] sm:$0xff]  ;;  %v258_v54 = vld [vmem:[%s932_s4 + $0x58] sm:$0xff] }
   0xd   :  { %650 = vmatpush3.bf16.msra.mxu0 %v647_v8  ;;  %v695_v52 = vpack.c.bf16 %v256_v51, %v255_v50  ;;  %v699_v55 = vpack.c.bf16 %v258_v54, %v257_v53  ;;  %v259_v56 = vld [vmem:[%s932_s4 + $0x60] sm:$0xff]  ;;  %v260_v57 = vld [vmem:[%s932_s4 + $0x68] sm:$0xff]  ;;  %v261_v59 = vld [vmem:[%s932_s4 + $0x70] sm:$0xff] }
   0xe   :  { %652 = vmatprep.subr.bf16.mxu0 %v651_v12  ;;  %v703_v58 = vpack.c.bf16 %v260_v57, %v259_v56  ;;  %v262_v60 = vld [vmem:[%s932_s4 + $0x78] sm:$0xff]  ;;  %v469_v62 = vld [vmem:[%s933_s3] ss:$0 sm:$0xff] }
   0xf   :  { %v707_v61 = vpack.c.bf16 %v262_v60, %v261_v59  ;;  %v474_v17 = vld [vmem:[%s935_s5] ss:$0 sm:$0xff] }
  0x11   :  { %654 = vmatpush3.bf16.msra.mxu0 %v651_v12 }
  0x12   :  { %656 = vmatprep.subr.bf16.mxu0 %v655_v15 }
  0x15   :  { %658 = vmatpush3.bf16.msra.mxu0 %v655_v15 }
  0x16   :  { %660 = vmatprep.subr.bf16.mxu0 %v659_v18 }
  0x19   :  { %662 = vmatpush3.bf16.msra.mxu0 %v659_v18 }
  0x1a   :  { %664 = vmatprep.subr.bf16.mxu0 %v663_v21 }
  0x1d   :  { %666 = vmatpush3.bf16.msra.mxu0 %v663_v21 }
  0x1e   :  { %668 = vmatprep.subr.bf16.mxu0 %v667_v24 }
  0x21   :  { %670 = vmatpush3.bf16.msra.mxu0 %v667_v24 }
  0x24   :  { %568 = vmatmul.mubr.f32.vlgmr.msra.gmra.mrb[0].mxu0 %v26_v25 }
  0x25   :  { %570 = vmatprep.mubr.f32.mxu0 %v27_v26 }
  0x28   :  { %571 = vmatmul.mubr.f32.gmra.mrb[2].mxu0 %v28_v27 }
  0x29   :  { %633 = vmatprep.mubr.msk.f32.mxu0 %vm141_vm0, %v130_v28 }
  0xf7   :  { %v569_v29 = vpop.f32.mrb[0].mxu0 }
  0xf8   :  { %v111_v30 = vpop.f32.mrb[1].mxu0 }
  0xf9   :  { %v671_v31 = vpack.c.bf16 %v569_v29, %v111_v30 }
  0xfb   :  { %v572_v34 = vpop.f32.mrb[2].mxu0  ;;  %672 = vmatprep.subr.bf16.mxu1 %v671_v31 }
  0xfc   :  { %v121_v35 = vpop.f32.mrb[3].mxu0  ;;  %674 = vmatpush3.bf16.msra.mxu1 %v671_v31 }
  0xfd   :  { %v675_v36 = vpack.c.bf16 %v572_v34, %v121_v35 }
  0xff   :  { %676 = vmatprep.subr.bf16.mxu1 %v675_v36 }
 0x100   :  { %678 = vmatpush3.bf16.msra.mxu1 %v675_v36 }
 0x101   :  { %680 = vmatprep.subr.bf16.mxu1 %v679_v37 }
 0x103   :  { %582 = vmatmul.mubr.msk.f32.vlgmr.msra.gmra.mrb[0].mxu1 %vm141_vm0, %v839_v40 }
 0x104   :  { %584 = vmatprep.mubr.msk.f32.mxu1 %vm141_vm0, %v844_v41  ;;  %682 = vmatpush3.bf16.msra.mxu1 %v679_v37 }
 0x105   :  { %684 = vmatprep.subr.bf16.mxu1 %v683_v42 }
 0x107   :  { %585 = vmatmul.mubr.msk.f32.gmra.mrb[2].mxu1 %vm141_vm0, %v859_v45 }
 0x108   :  { %686 = vmatpush3.bf16.msra.mxu1 %v683_v42 }
 0x109   :  { %688 = vmatprep.subr.bf16.mxu1 %v687_v46 }
 0x10c   :  { %690 = vmatpush3.bf16.msra.mxu1 %v687_v46 }
 0x10d   :  { %692 = vmatprep.subr.bf16.mxu1 %v691_v49 }
 0x110   :  { %694 = vmatpush3.bf16.msra.mxu1 %v691_v49 }
 0x111   :  { %696 = vmatprep.subr.bf16.mxu1 %v695_v52 }
 0x114   :  { %698 = vmatpush3.bf16.msra.mxu1 %v695_v52 }
 0x115   :  { %700 = vmatprep.subr.bf16.mxu1 %v699_v55 }
 0x118   :  { %702 = vmatpush3.bf16.msra.mxu1 %v699_v55 }
 0x119   :  { %704 = vmatprep.subr.bf16.mxu1 %v703_v58 }
 0x11c   :  { %706 = vmatpush3.bf16.msra.mxu1 %v703_v58 }
 0x11d   :  { %708 = vmatprep.subr.bf16.mxu1 %v707_v61 }
 0x120   :  { %710 = vmatpush3.bf16.msra.mxu1 %v707_v61 }
 0x1d6   :  { %v583_v63 = vpop.f32.mrb[0].mxu1 }
 0x1d7   :  { %v226_v0 = vadd.f32 %v583_v63, %v469_v62  ;;  %v220_v1 = vpop.f32.mrb[1].mxu1 }
 0x1d8   :  { %v221_v2 = vadd.f32 %v469_v62, %v220_v1 }
 0x1d9   :  { %v240_v3 = vmax.f32 %v226_v0, 0.0 }
 0x1da   :  { %v239_v4 = vmax.f32 %v221_v2, 0.0  ;;  %v586_v5 = vpop.f32.mrb[2].mxu1 }
 0x1db   :  { %244 = vst [vmem:[%s934_s6 + $0x8] sm:$0xff] %v240_v3  ;;  %v236_v6 = vadd.f32 %v586_v5, %v469_v62  ;;  %v230_v7 = vpop.f32.mrb[3].mxu1 }
 0x1dc   :  { %243 = vst [vmem:[%s934_s6] sm:$0xff] %v239_v4  ;;  %v231_v8 = vadd.f32 %v469_v62, %v230_v7  ;;  %619 = vmatprep.mubr.f32.mxu1 %v239_v4 }
 0x1dd   :  { %v242_v9 = vmax.f32 %v236_v6, 0.0  ;;  %620 = vmatmul.mubr.f32.vlgmr.msra.gmra.mrb[4].mxu1 %v240_v3 }
 0x1de   :  { %v241_v10 = vmax.f32 %v231_v8, 0.0 }
 0x1df   :  { %246 = vst [vmem:[%s934_s6 + $0x18] sm:$0xff] %v242_v9 }
 0x1e0   :  { %245 = vst [vmem:[%s934_s6 + $0x10] sm:$0xff] %v241_v10  ;;  %622 = vmatprep.mubr.f32.mxu1 %v241_v10 }
 0x1e1   :  { %623 = vmatmul.mubr.f32.gmra.mrb[6].mxu1 %v242_v9 }
 0x2b0   :  { %v621_v11 = vpop.f32.mrb[4].mxu1 }
 0x2b1   :  { %v329_v12 = vpop.f32.mrb[5].mxu1 }
 0x2b2   :  { %v711_v13 = vpack.c.bf16 %v621_v11, %v329_v12 }
 0x2b4   :  { %v624_v14 = vpop.f32.mrb[6].mxu1  ;;  %712 = vmatprep.subr.bf16.mxu0 %v711_v13 }
 0x2b5   :  { %v339_v15 = vpop.f32.mrb[7].mxu1  ;;  %714 = vmatpush3.bf16.msra.mxu0 %v711_v13 }
 0x2b6   :  { %v715_v16 = vpack.c.bf16 %v624_v14, %v339_v15 }
 0x2b8   :  { %716 = vmatprep.subr.bf16.mxu0 %v715_v16 }
 0x2b9   :  { %718 = vmatpush3.bf16.msra.mxu0 %v715_v16 }
 0x2bc   :  { %634 = vmatmul.mubr.msk.f32.vlgmr.msra.gmra.mrb[4].mxu0 %vm141_vm0, %v839_v40 }
 0x2bd   :  { %636 = vmatprep.mubr.msk.f32.mxu0 %vm141_vm0, %v844_v41 }
 0x2c0   :  { %637 = vmatmul.mubr.msk.f32.gmra.mrb[6].mxu0 %vm141_vm0, %v859_v45 }
 0x38f   :  { %v635_v18 = vpop.f32.mrb[4].mxu0 }
 0x390   :  { %v443_v19 = vadd.f32 %v635_v18, %v474_v17  ;;  %v437_v20 = vpop.f32.mrb[5].mxu0 }
 0x391   :  { %v438_v21 = vadd.f32 %v474_v17, %v437_v20 }
 0x392   :  { %458 = vst.msk [vmem:[%s936_s7 + $0x8] sm:$0xff] %vm456_vm1, %v443_v19 }
 0x393   :  { %457 = vst.msk [vmem:[%s936_s7] sm:$0xff] %vm456_vm1, %v438_v21  ;;  %v638_v22 = vpop.f32.mrb[6].mxu0 }
 0x394   :  { %v453_v23 = vadd.f32 %v638_v22, %v474_v17  ;;  %v447_v24 = vpop.f32.mrb[7].mxu0 }
 0x395   :  { %v448_v25 = vadd.f32 %v474_v17, %v447_v24 }
 0x396   :  { %460 = vst.msk [vmem:[%s936_s7 + $0x18] sm:$0xff] %vm456_vm1, %v453_v23 }
 0x397   :  { %459 = vst.msk [vmem:[%s936_s7 + $0x10] sm:$0xff] %vm456_vm1, %v448_v25 }

// kernel: mynet_forward.3
= control target key start
LH: loop header
LB: loop body
LE: loop exit
PB: predicated region body
PF: predicated region fallthrough
CT: control target
= control target key end

     0   :  { %v608_v0 = vmov 0   ;;  %v609_v4 = vmov 0.0|0.0   ;;  %vm610_vm0 = vmmov 0   ;;  %v611_v22 = vmov 0.0   ;;  %s816_s2 = inlined_call_operand.vmem [shape: f32[24,1], index: 2, kind: input, shape index: {}]   ;;  %s817_s3 = inlined_call_operand.vmem [shape: f32[128,128], index: 3, kind: input, shape index: {}]   ;;  %s818_s1 = inlined_call_operand.vmem [shape: f32[24,128], index: 1, kind: input, shape index: {}]   ;;  %s819_s5 = inlined_call_operand.vmem [shape: f32[128,128], index: 5, kind: input, shape index: {}]   ;;  %s820_s0 = inlined_call_operand.vmem [shape: f32[24,24], index: 0, kind: input, shape index: {}]   ;;  %s821_s4 = inlined_call_operand.vmem [shape: f32[1,128], index: 4, kind: input, shape index: {}]   ;;  %s822_s6 = inlined_call_operand.vmem [shape: f32[1,128], index: 6, kind: input, shape index: {}]   ;;  %s823_s7 = inlined_call_operand.vmem [shape: f32[2,128], index: 7, kind: output, shape index: {}]  }
   0x1   :  { %596 = vset.pattern.permute.xlu0 %v608_v0  ;;  %v29_v1 = vld [vmem:[%s816_s2] sm:$0xff]  ;;  %v30_v2 = vld [vmem:[%s816_s2 + $0x8] sm:$0xff]  ;;  %597 = vset.pattern.permute.xlu1 %v608_v0  ;;  %v31_v3 = vld [vmem:[%s816_s2 + $0x10] sm:$0xff]  ;;  %vm159_vm1 = vcmask 195584   ;;  %vm296_vm4 = vcmask 1040384  }
   0x2   :  { %598 = vtanh.f32 %v29_v1  ;;  %541 = vmatprep.subr.bf16.mxu0 %v609_v4  ;;  %v53_v5 = vld [vmem:[%s817_s3] sm:$0xff]  ;;  %v54_v6 = vld [vmem:[%s817_s3 + $0x8] sm:$0xff]  ;;  %v55_v7 = vld [vmem:[%s817_s3 + $0x10] sm:$0xff]  ;;  %565 = vmatprep.subr.bf16.mxu1 %v609_v4 }
   0x3   :  { %600 = vtanh.f32 %v30_v2  ;;  %v542_v8 = vpack.c.bf16 %v54_v6, %v53_v5  ;;  %v56_v9 = vld [vmem:[%s817_s3 + $0x18] sm:$0xff]  ;;  %v57_v11 = vld [vmem:[%s817_s3 + $0x20] sm:$0xff]  ;;  %v58_v12 = vld [vmem:[%s817_s3 + $0x28] sm:$0xff]  ;;  %482 = vmatprep.mubr.msk.f32.mxu0 %vm610_vm0, %v611_v22  ;;  %497 = vmatprep.mubr.msk.f32.mxu1 %vm610_vm0, %v611_v22 }
   0x4   :  { %602 = vtanh.f32 %v31_v3  ;;  %v545_v10 = vpack.c.bf16 %v56_v9, %v55_v7  ;;  %v548_v13 = vpack.c.bf16 %v58_v12, %v57_v11  ;;  %v59_v14 = vld [vmem:[%s817_s3 + $0x30] sm:$0xff]  ;;  %v60_v15 = vld [vmem:[%s817_s3 + $0x38] sm:$0xff]  ;;  %v61_v20 = vld [vmem:[%s817_s3 + $0x40] sm:$0xff] }
   0x5   :  { %543 = vmatpush3.bf16.msra.mxu0 %v542_v8  ;;  %v551_v18 = vpack.c.bf16 %v60_v15, %v59_v14  ;;  %v62_v21 = vld [vmem:[%s817_s3 + $0x48] sm:$0xff]  ;;  %v63_v24 = vld [vmem:[%s817_s3 + $0x50] sm:$0xff]  ;;  %v64_v25 = vld [vmem:[%s817_s3 + $0x58] sm:$0xff] }
   0x6   :  { %544 = vmatprep.subr.bf16.mxu0 %v609_v4  ;;  %v554_v23 = vpack.c.bf16 %v62_v21, %v61_v20  ;;  %v557_v26 = vpack.c.bf16 %v64_v25, %v63_v24  ;;  %v65_v27 = vld [vmem:[%s817_s3 + $0x60] sm:$0xff]  ;;  %v66_v28 = vld [vmem:[%s817_s3 + $0x68] sm:$0xff]  ;;  %v67_v30 = vld [vmem:[%s817_s3 + $0x70] sm:$0xff] }
   0x7   :  { %v560_v29 = vpack.c.bf16 %v66_v28, %v65_v27  ;;  %v68_v31 = vld [vmem:[%s817_s3 + $0x78] sm:$0xff]  ;;  %v26_v33 = vld [vmem:[%s818_s1] sm:$0xff]  ;;  %v27_v36 = vld [vmem:[%s818_s1 + $0x8] sm:$0xff] }
   0x8   :  { %v563_v32 = vpack.c.bf16 %v68_v31, %v67_v30  ;;  %v28_v39 = vld [vmem:[%s818_s1 + $0x10] sm:$0xff]  ;;  %v298_v47 = vld [vmem:[%s819_s5] sm:$0xff]  ;;  %v299_v48 = vld [vmem:[%s819_s5 + $0x8] sm:$0xff] }
   0x9   :  { %546 = vmatpush3.bf16.msra.mxu0 %v545_v10  ;;  %v149_v51 = vld [vmem:[%s820_s0] sm:$0xff]  ;;  %v569_v52 = vpack.c.bf16 %v299_v48, %v298_v47  ;;  %v150_v53 = vld [vmem:[%s820_s0 + $0x8] sm:$0xff]  ;;  %v151_v54 = vld [vmem:[%s820_s0 + $0x10] sm:$0xff] }
   0xa   :  { %547 = vmatprep.subr.bf16.mxu0 %v609_v4  ;;  %v300_v55 = vld [vmem:[%s819_s5 + $0x10] sm:$0xff]  ;;  %v301_v56 = vld [vmem:[%s819_s5 + $0x18] sm:$0xff]  ;;  %v302_v58 = vld [vmem:[%s819_s5 + $0x20] sm:$0xff] }
   0xb   :  { %v572_v57 = vpack.c.bf16 %v301_v56, %v300_v55  ;;  %v303_v59 = vld [vmem:[%s819_s5 + $0x28] sm:$0xff]  ;;  %v304_v61 = vld [vmem:[%s819_s5 + $0x30] sm:$0xff]  ;;  %v305_v62 = vld [vmem:[%s819_s5 + $0x38] sm:$0xff] }
   0xc   :  { %v599_v16 = vpop.eup %598  ;;  %v575_v60 = vpack.c.bf16 %v303_v59, %v302_v58  ;;  %v578_v63 = vpack.c.bf16 %v305_v62, %v304_v61  ;;  %v306_v0 = vld [vmem:[%s819_s5 + $0x40] sm:$0xff]  ;;  %v307_v1 = vld [vmem:[%s819_s5 + $0x48] sm:$0xff]  ;;  %v308_v3 = vld [vmem:[%s819_s5 + $0x50] sm:$0xff] }
   0xd   :  { %v601_v17 = vpop.eup %600  ;;  %37 = vperm.xlu0 %596, %v599_v16   ;;  %549 = vmatpush3.bf16.msra.mxu0 %v548_v13  ;;  %v581_v2 = vpack.c.bf16 %v307_v1, %v306_v0  ;;  %v309_v5 = vld [vmem:[%s819_s5 + $0x58] sm:$0xff]  ;;  %v310_v7 = vld [vmem:[%s819_s5 + $0x60] sm:$0xff]  ;;  %v311_v8 = vld [vmem:[%s819_s5 + $0x68] sm:$0xff]  ;;  %v252_v13 = vlaneseq }
   0xe   :  { %v603_v19 = vpop.eup %602  ;;  %550 = vmatprep.subr.bf16.mxu0 %v609_v4  ;;  %v584_v6 = vpack.c.bf16 %v309_v5, %v308_v3  ;;  %v587_v9 = vpack.c.bf16 %v311_v8, %v310_v7  ;;  %v312_v10 = vld [vmem:[%s819_s5 + $0x70] sm:$0xff]  ;;  %v313_v11 = vld [vmem:[%s819_s5 + $0x78] sm:$0xff]  ;;  %v402_v16 = vld [vmem:[%s821_s4] ss:$0 sm:$0xff] }
   0xf   :  { %47 = vperm.xlu1 %597, %v603_v19   ;;  %v590_v12 = vpack.c.bf16 %v313_v11, %v312_v10  ;;  %v253_v14 = vshrl.u32 %v252_v13, 7 }
  0x11   :  { %42 = vperm.xlu0 %596, %v601_v17   ;;  %552 = vmatpush3.bf16.msra.mxu0 %v551_v18  ;;  %v254_v18 = vadd.s32 8, %v253_v14 }
  0x12   :  { %553 = vmatprep.subr.bf16.mxu0 %v609_v4 }
  0x13   :  { %vm260_vm2 = vcmp.lt.s32.totalorder %v254_v18, 12  ;;  %vm277_vm3 = vcmp.ge.s32.totalorder %v254_v18, 12 }
  0x15   :  { %555 = vmatpush3.bf16.msra.mxu0 %v554_v23 }
  0x16   :  { %556 = vmatprep.subr.bf16.mxu0 %v609_v4 }
  0x19   :  { %558 = vmatpush3.bf16.msra.mxu0 %v557_v26 }
  0x1a   :  { %559 = vmatprep.subr.bf16.mxu0 %v609_v4 }
  0x1d   :  { %561 = vmatpush3.bf16.msra.mxu0 %v560_v29 }
  0x1e   :  { %562 = vmatprep.subr.bf16.mxu0 %v609_v4 }
  0x21   :  { %564 = vmatpush3.bf16.msra.mxu0 %v563_v32 }
  0x8c   :  { %v38_v34 = vpop.permute.xlu0 %37 }
  0x8d   :  { %v50_v35 = vmul.f32 %v38_v34, %v26_v33 }
  0x8e   :  { %v48_v38 = vpop.permute.xlu1 %47 }
  0x8f   :  { %483 = vmatmul.mubr.f32.vlgmr.msra.gmra.mrb[0].mxu0 %v50_v35  ;;  %v52_v41 = vmul.f32 %v48_v38, %v28_v39 }
  0x90   :  { %v43_v37 = vpop.permute.xlu0 %42  ;;  %485 = vmatprep.mubr.msk.f32.mxu0 %vm610_vm0, %v611_v22 }
  0x91   :  { %v51_v40 = vmul.f32 %v43_v37, %v27_v36 }
  0x93   :  { %486 = vmatmul.mubr.f32.gmra.mrb[2].mxu0 %v51_v40 }
  0x94   :  { %488 = vmatprep.mubr.msk.f32.mxu0 %vm610_vm0, %v611_v22 }
  0x97   :  { %489 = vmatmul.mubr.f32.gmra.mrb[4].mxu0 %v52_v41 }
 0x162   :  { %v135_v42 = vpop.f32.mrb[0].mxu0 }
 0x163   :  { %v484_v43 = vpop.f32.mrb[1].mxu0 }
 0x166   :  { %v140_v44 = vpop.f32.mrb[2].mxu0 }
 0x167   :  { %v566_v45 = vpack.c.bf16 %v140_v44, %v135_v42  ;;  %v487_v46 = vpop.f32.mrb[3].mxu0 }
 0x169   :  { %567 = vmatpush3.bf16.msra.mxu1 %v566_v45  ;;  %v406_v45 = vld [vmem:[%s822_s6] ss:$0 sm:$0xff] }
 0x16a   :  { %v145_v49 = vpop.f32.mrb[4].mxu0  ;;  %495 = vmatprep.subr.mxu1 %v611_v22 }
 0x16b   :  { %v490_v50 = vpop.f32.mrb[5].mxu0 }
 0x16d   :  { %496 = vmatpush3.msra.mxu1 %v145_v49 }
 0x16e   :  { %498 = vmatmul.mubr.msk.f32.vlgmr.msra.gmra.mrb[0].mxu1 %vm159_vm1, %v149_v51  ;;  %568 = vmatprep.subr.bf16.mxu1 %v609_v4 }
 0x16f   :  { %500 = vmatprep.mubr.msk.f32.mxu1 %vm610_vm0, %v611_v22  ;;  %570 = vmatpush3.bf16.msra.mxu1 %v569_v52 }
 0x170   :  { %571 = vmatprep.subr.bf16.mxu1 %v609_v4 }
 0x172   :  { %501 = vmatmul.mubr.msk.f32.gmra.mrb[2].mxu1 %vm159_vm1, %v150_v53 }
 0x173   :  { %503 = vmatprep.mubr.msk.f32.mxu1 %vm610_vm0, %v611_v22  ;;  %573 = vmatpush3.bf16.msra.mxu1 %v572_v57 }
 0x174   :  { %574 = vmatprep.subr.bf16.mxu1 %v609_v4 }
 0x176   :  { %504 = vmatmul.mubr.msk.f32.gmra.mrb[4].mxu1 %vm159_vm1, %v151_v54 }
 0x177   :  { %538 = vmatprep.mubr.msk.f32.mxu1 %vm610_vm0, %v611_v22  ;;  %576 = vmatpush3.bf16.msra.mxu1 %v575_v60 }
 0x178   :  { %577 = vmatprep.subr.bf16.mxu1 %v609_v4 }
 0x17b   :  { %579 = vmatpush3.bf16.msra.mxu1 %v578_v63 }
 0x17c   :  { %580 = vmatprep.subr.bf16.mxu1 %v609_v4 }
 0x17f   :  { %582 = vmatpush3.bf16.msra.mxu1 %v581_v2 }
 0x180   :  { %583 = vmatprep.subr.bf16.mxu1 %v609_v4 }
 0x183   :  { %585 = vmatpush3.bf16.msra.mxu1 %v584_v6 }
 0x184   :  { %586 = vmatprep.subr.bf16.mxu1 %v609_v4 }
 0x187   :  { %588 = vmatpush3.bf16.msra.mxu1 %v587_v9 }
 0x188   :  { %589 = vmatprep.subr.bf16.mxu1 %v609_v4 }
 0x18b   :  { %591 = vmatpush3.bf16.msra.mxu1 %v590_v12 }
 0x241   :  { %v235_v15 = vpop.f32.mrb[0].mxu1 }
 0x242   :  { %v499_v17 = vpop.f32.mrb[1].mxu1  ;;  %v236_v4 = vadd.f32 %v402_v16, %v235_v15 }
 0x244   :  { %v249_v23 = vmax.f32 %v236_v4, 0.0 }
 0x245   :  { %v240_v19 = vpop.f32.mrb[2].mxu1 }
 0x246   :  { %v241_v20 = vadd.f32 %v402_v16, %v240_v19  ;;  %v502_v21 = vpop.f32.mrb[3].mxu1 }
 0x248   :  { %v250_v22 = vmax.f32 %v241_v20, 0.0 }
 0x249   :  { %v245_v24 = vpop.f32.mrb[4].mxu1 }
 0x24a   :  { %v266_v25 = vsel %vm260_vm2, %v250_v22, -inf  ;;  %v246_v26 = vadd.f32 %v402_v16, %v245_v24  ;;  %v505_v27 = vpop.f32.mrb[5].mxu1  ;;  %v286_v31 = vsel %vm277_vm3, %v250_v22, -inf }
 0x24b   :  { %v268_v28 = vmax.f32 %v249_v23, %v266_v25 }
 0x24c   :  { %v251_v29 = vmax.f32 %v246_v26, 0.0 }
 0x24d   :  { %v270_v30 = vrot.slane %v268_v28, 4 }
 0x24e   :  { %v289_v32 = vmax.f32 %v286_v31, %v251_v29 }
 0x24f   :  { %v271_v33 = vmax.f32 %v268_v28, %v270_v30 }
 0x250   :  { %v290_v34 = vrot.slane %v289_v32, 4 }
 0x251   :  { %v272_v35 = vrot.slane %v271_v33, 2 }
 0x252   :  { %v291_v36 = vmax.f32 %v289_v32, %v290_v34 }
 0x253   :  { %v273_v37 = vmax.f32 %v271_v33, %v272_v35 }
 0x254   :  { %v292_v38 = vrot.slane %v291_v36, 2 }
 0x255   :  { %v274_v39 = vrot.slane %v273_v37, 1 }
 0x256   :  { %v293_v40 = vmax.f32 %v291_v36, %v292_v38 }
 0x257   :  { %v275_v42 = vmax.f32 %v273_v37, %v274_v39 }
 0x258   :  { %v294_v41 = vrot.slane %v293_v40, 1 }
 0x25a   :  { %v295_v43 = vmax.f32 %v293_v40, %v294_v41 }
 0x25c   :  { %v297_v44 = vsel %vm296_vm4, %v275_v42, %v295_v43 }
 0x25d   :  { %539 = vmatmul.mubr.f32.vlgmr.msra.gmra.mrb[6].mxu1 %v297_v44 }
 0x330   :  { %v387_v46 = vpop.f32.mrb[6].mxu1 }
 0x331   :  { %v388_v47 = vadd.f32 %v406_v45, %v387_v46  ;;  %v540_v48 = vpop.f32.mrb[7].mxu1 }
 0x333   :  { %v407_v49 = vmul.f32 -1.442695, %v388_v47 }
 0x335   :  { %604 = vpow2.f32 %v407_v49 }
 0x33f   :  { %v605_v50 = vpop.eup %604 }
 0x340   :  { %v394_v51 = vadd.f32 1.0, %v605_v50 }
 0x342   :  { %606 = vrcp.f32 %v394_v51 }
 0x34c   :  { %v607_v52 = vpop.eup %606 }
 0x34d   :  { %397 = vst [vmem:[%s823_s7] sm:$0x3] %v607_v52 }

</bundles_post_ra>
